<compile_context>
chip_gen: v5e
topology: v5e:2x2
jax: 0.10.0
libtpu: 0.0.40
codegen_flags: <defaults>
</compile_context>

<pallas_src>
import functools

import jax
import jax.numpy as jnp
from jax import lax
from jax.experimental import pallas as pl
from jax.experimental.pallas import tpu as pltpu


# ---------------------------------------------------------------------------
# Kernels
# ---------------------------------------------------------------------------
def instance_norm_kernel(x_ref, w_ref, b_ref, o_ref, *, eps, inv_n):
    """InstanceNorm2d(affine=True) on one (batch-row, channel-tile) block.

    x_ref / o_ref: (c_tile, HW)   (batch dim squeezed by BlockSpec)
    w_ref / b_ref: (c_tile, 1)
    """
    xf = x_ref[...].astype(jnp.float32)
    # Single pass: sum and sum-of-squares over the spatial (lane) axis.
    s = jnp.sum(xf, axis=1, keepdims=True)             # (c_tile, 1)
    ss = jnp.sum(xf * xf, axis=1, keepdims=True)       # (c_tile, 1)
    mean = s * inv_n
    var = jnp.maximum(ss * inv_n - mean * mean, 0.0)
    # Fold affine into scale/shift -> normalize pass is a single FMA/elem.
    scale = w_ref[...].astype(jnp.float32) * lax.rsqrt(var + eps)
    shift = b_ref[...].astype(jnp.float32) - mean * scale
    o_ref[...] = (xf * scale + shift).astype(o_ref.dtype)


def batch_norm_kernel(x_ref, w_ref, b_ref, o_ref, *, eps, inv_n):
    """BatchNorm2d (training-mode batch stats) on one channel-tile block.

    x_ref / o_ref: (N, c_tile, HW)
    w_ref / b_ref: (c_tile, 1)
    """
    xf = x_ref[...].astype(jnp.float32)
    s = jnp.sum(xf, axis=(0, 2), keepdims=True)         # (1, c_tile, 1)
    ss = jnp.sum(xf * xf, axis=(0, 2), keepdims=True)   # (1, c_tile, 1)
    mean = s * inv_n
    var = jnp.maximum(ss * inv_n - mean * mean, 0.0)
    w = w_ref[...].astype(jnp.float32)[None, :, :]      # (1, c_tile, 1)
    b = b_ref[...].astype(jnp.float32)[None, :, :]
    scale = w * lax.rsqrt(var + eps)
    shift = b - mean * scale
    o_ref[...] = (xf * scale + shift).astype(o_ref.dtype)


# ---------------------------------------------------------------------------
# Tiling helper
# ---------------------------------------------------------------------------
def _pick_channel_tile(ndim, bytes_per_channel, budget_bytes):
    """Largest multiple-of-8 divisor of `ndim` whose block fits the budget.

    Falls back to the full channel extent when ndim is not 8-aligned (a
    full-extent block dim is always legal for BlockSpec).
    """
    if ndim % 8 != 0:
        return ndim
    tile = 8
    for t in range(8, ndim + 1, 8):
        if ndim % t == 0 and t * bytes_per_channel <= budget_bytes:
            tile = t
    return tile


# ---------------------------------------------------------------------------
# Wrapper
# ---------------------------------------------------------------------------
def ibn_forward(x, in_w, in_b, bn_w, bn_b, *, eps=1e-5,
                block_budget_bytes=2 * 1024 * 1024):
    """x: (N, C, H, W) NCHW. Returns (N, C, H, W)."""
    N, C, H, W = x.shape
    ndim = C // 2
    HW = H * W
    itemsize = jnp.dtype(x.dtype).itemsize

    xf = x.reshape(N, C, HW)
    # Wrapper-side channel split: free layout plumbing, keeps every kernel
    # block sublane-aligned and every store lane-dense over the full HW axis.
    x1 = xf[:, :ndim, :]
    x2 = xf[:, ndim:, :]

    in_w2 = in_w.reshape(ndim, 1)
    in_b2 = in_b.reshape(ndim, 1)
    bn_w2 = bn_w.reshape(ndim, 1)
    bn_b2 = bn_b.reshape(ndim, 1)

    # ---------------- InstanceNorm half: grid over (batch, channel tiles) ---
    c_in = _pick_channel_tile(ndim, HW * itemsize, block_budget_bytes)
    in_grid = (N, ndim // c_in)
    inv_hw = 1.0 / float(HW)

    out1 = pl.pallas_call(
        functools.partial(instance_norm_kernel, eps=eps, inv_n=inv_hw),
        out_shape=jax.ShapeDtypeStruct((N, ndim, HW), x.dtype),
        grid=in_grid,
        in_specs=[
            pl.BlockSpec((pl.Squeezed(), c_in, HW), lambda n, c: (n, c, 0)),
            pl.BlockSpec((c_in, 1), lambda n, c: (c, 0)),
            pl.BlockSpec((c_in, 1), lambda n, c: (c, 0)),
        ],
        out_specs=pl.BlockSpec((pl.Squeezed(), c_in, HW),
                               lambda n, c: (n, c, 0)),
        compiler_params=pltpu.CompilerParams(
            dimension_semantics=("parallel", "parallel")),
        cost_estimate=pl.CostEstimate(
            flops=6 * N * ndim * HW,
            transcendentals=N * ndim,
            bytes_accessed=2 * N * ndim * HW * itemsize + 2 * ndim * itemsize),
    )(x1, in_w2, in_b2)

    # ---------------- BatchNorm half: grid over channel tiles ---------------
    # Full (N, HW) slab per channel tile so batch stats are single-pass.
    # TODO(synk): for extreme N*HW where even an 8-channel slab exceeds scoped
    #             VMEM, switch to a two-pass (stats then normalize) structure.
    c_bn = _pick_channel_tile(ndim, N * HW * itemsize, block_budget_bytes)
    bn_grid = (ndim // c_bn,)
    inv_nhw = 1.0 / float(N * HW)

    out2 = pl.pallas_call(
        functools.partial(batch_norm_kernel, eps=eps, inv_n=inv_nhw),
        out_shape=jax.ShapeDtypeStruct((N, ndim, HW), x.dtype),
        grid=bn_grid,
        in_specs=[
            pl.BlockSpec((N, c_bn, HW), lambda c: (0, c, 0)),
            pl.BlockSpec((c_bn, 1), lambda c: (c, 0)),
            pl.BlockSpec((c_bn, 1), lambda c: (c, 0)),
        ],
        out_specs=pl.BlockSpec((N, c_bn, HW), lambda c: (0, c, 0)),
        compiler_params=pltpu.CompilerParams(
            dimension_semantics=("parallel",)),
        cost_estimate=pl.CostEstimate(
            flops=6 * N * ndim * HW,
            transcendentals=ndim,
            bytes_accessed=2 * N * ndim * HW * itemsize + 2 * ndim * itemsize),
    )(x2, bn_w2, bn_b2)

    # TODO(synk): BatchNorm running_mean/running_var side effect (momentum
    #             update) is not produced; only the normalized forward output.
    return jnp.concatenate([out1, out2], axis=1).reshape(N, C, H, W)


# ---------------------------------------------------------------------------
# Pure-JAX reference (mirrors PyTorch IBN forward, training mode)
# ---------------------------------------------------------------------------
def ibn_reference(x, in_w, in_b, bn_w, bn_b, eps=1e-5):
    x = x.astype(jnp.float32)
    N, C, H, W = x.shape
    ndim = C // 2
    x1, x2 = x[:, :ndim], x[:, ndim:]

    m1 = x1.mean(axis=(2, 3), keepdims=True)
    v1 = ((x1 - m1) ** 2).mean(axis=(2, 3), keepdims=True)
    o1 = (x1 - m1) / jnp.sqrt(v1 + eps) * in_w[None, :, None, None] \
         + in_b[None, :, None, None]

    m2 = x2.mean(axis=(0, 2, 3), keepdims=True)
    v2 = ((x2 - m2) ** 2).mean(axis=(0, 2, 3), keepdims=True)
    o2 = (x2 - m2) / jnp.sqrt(v2 + eps) * bn_w[None, :, None, None] \
         + bn_b[None, :, None, None]

    return jnp.concatenate([o1, o2], axis=1)


if __name__ == "__main__":
    key = jax.random.PRNGKey(0)
    N, C, H, W = 2, 4, 16, 16   # planes = 4 -> ndim = 2
    ndim = C // 2

    kx, kiw, kib, kbw, kbb = jax.random.split(key, 5)
    x = jax.random.normal(kx, (N, C, H, W), dtype=jnp.float32)

    # Deterministic non-trivial affine parameters (PyTorch default is w=1,b=0).
    in_w = 1.0 + 0.1 * jax.random.normal(kiw, (ndim,), dtype=jnp.float32)
    in_b = 0.1 * jax.random.normal(kib, (ndim,), dtype=jnp.float32)
    bn_w = 1.0 + 0.1 * jax.random.normal(kbw, (ndim,), dtype=jnp.float32)
    bn_b = 0.1 * jax.random.normal(kbb, (ndim,), dtype=jnp.float32)

    out = ibn_forward(x, in_w, in_b, bn_w, bn_b)
    out = jax.block_until_ready(out)

    ref = ibn_reference(x, in_w, in_b, bn_w, bn_b)
    assert out.shape == (N, C, H, W)
    assert jnp.allclose(out.astype(jnp.float32), ref, atol=1e-4, rtol=1e-4), \
        "mismatch vs reference"

    print("KERNEL_OK")
</pallas_src>

<mosaic_0001>
module attributes {stable_mosaic.version = 11 : i64} {
  func.func @instance_norm_kernel(%arg0: i32, %arg1: i32, %arg2: memref<1x2x256xf32, #tpu.memory_space<vmem>>, %arg3: memref<2x1xf32, #tpu.memory_space<vmem>>, %arg4: memref<2x1xf32, #tpu.memory_space<vmem>>, %arg5: memref<1x2x256xf32, #tpu.memory_space<vmem>>) attributes {dimension_semantics = [#tpu.dimension_semantics<parallel>, #tpu.dimension_semantics<parallel>], iteration_bounds = array<i64: 2, 1>, scalar_prefetch = 0 : i64, scratch_operands = 0 : i64, tpu.core_type = #tpu.core_type<tc>, window_params = [{transform_indices = @transform_0, window_bounds = array<i64: 1, 2, 256>}, {transform_indices = @transform_1, window_bounds = array<i64: 2, 1>}, {transform_indices = @transform_2, window_bounds = array<i64: 2, 1>}, {transform_indices = @transform_3, window_bounds = array<i64: 1, 2, 256>}]} {
    %c0 = arith.constant 0 : index
    %c0_0 = arith.constant 0 : index
    %c0_1 = arith.constant 0 : index
    %0 = vector.load %arg2[%c0, %c0_0, %c0_1] : memref<1x2x256xf32, #tpu.memory_space<vmem>>, vector<1x2x256xf32>
    %1 = vector.shape_cast %0 : vector<1x2x256xf32> to vector<2x256xf32>
    %cst = arith.constant dense<0.000000e+00> : vector<2xf32>
    %2 = vector.multi_reduction <add>, %1, %cst [1] : vector<2x256xf32> to vector<2xf32>
    %3 = vector.shape_cast %2 : vector<2xf32> to vector<2x1xf32>
    %4 = arith.mulf %1, %1 : vector<2x256xf32>
    %cst_2 = arith.constant dense<0.000000e+00> : vector<2xf32>
    %5 = vector.multi_reduction <add>, %4, %cst_2 [1] : vector<2x256xf32> to vector<2xf32>
    %6 = vector.shape_cast %5 : vector<2xf32> to vector<2x1xf32>
    %cst_3 = arith.constant 3.906250e-03 : f32
    %7 = vector.broadcast %cst_3 : f32 to vector<2x1xf32>
    %8 = arith.mulf %3, %7 : vector<2x1xf32>
    %cst_4 = arith.constant 3.906250e-03 : f32
    %9 = vector.broadcast %cst_4 : f32 to vector<2x1xf32>
    %10 = arith.mulf %6, %9 : vector<2x1xf32>
    %11 = arith.mulf %8, %8 : vector<2x1xf32>
    %12 = arith.subf %10, %11 : vector<2x1xf32>
    %cst_5 = arith.constant 0.000000e+00 : f32
    %13 = vector.broadcast %cst_5 : f32 to vector<2x1xf32>
    %14 = arith.maximumf %12, %13 : vector<2x1xf32>
    %c0_6 = arith.constant 0 : index
    %c0_7 = arith.constant 0 : index
    %15 = vector.load %arg3[%c0_6, %c0_7] : memref<2x1xf32, #tpu.memory_space<vmem>>, vector<2x1xf32>
    %cst_8 = arith.constant 9.99999974E-6 : f32
    %16 = vector.broadcast %cst_8 : f32 to vector<2x1xf32>
    %17 = arith.addf %14, %16 : vector<2x1xf32>
    %18 = math.rsqrt %17 : vector<2x1xf32>
    %19 = arith.mulf %15, %18 : vector<2x1xf32>
    %c0_9 = arith.constant 0 : index
    %c0_10 = arith.constant 0 : index
    %20 = vector.load %arg4[%c0_9, %c0_10] : memref<2x1xf32, #tpu.memory_space<vmem>>, vector<2x1xf32>
    %21 = arith.mulf %8, %19 : vector<2x1xf32>
    %22 = arith.subf %20, %21 : vector<2x1xf32>
    %23 = vector.broadcast %19 : vector<2x1xf32> to vector<2x256xf32>
    %24 = arith.mulf %1, %23 : vector<2x256xf32>
    %25 = vector.broadcast %22 : vector<2x1xf32> to vector<2x256xf32>
    %26 = arith.addf %24, %25 : vector<2x256xf32>
    %c0_11 = arith.constant 0 : index
    %c0_12 = arith.constant 0 : index
    %c0_13 = arith.constant 0 : index
    %27 = vector.load %arg5[%c0_11, %c0_12, %c0_13] : memref<1x2x256xf32, #tpu.memory_space<vmem>>, vector<1x2x256xf32>
    %28 = vector.shape_cast %27 : vector<1x2x256xf32> to vector<2x256xf32>
    %29 = vector.shape_cast %26 : vector<2x256xf32> to vector<1x2x256xf32>
    tpu.vector_store %arg5[%c0_11, %c0_12, %c0_13], %29 {strides = array<i32>} : memref<1x2x256xf32, #tpu.memory_space<vmem>>, vector<1x2x256xf32>,
    return
  }
  func.func @transform_0(%arg0: i32, %arg1: i32) -> (i32, i32, i32) {
    %c0_i32 = arith.constant 0 : i32
    %c0_i32_0 = arith.constant 0 : i32
    return %arg0, %arg1, %c0_i32 : i32, i32, i32
  }
  func.func @transform_1(%arg0: i32, %arg1: i32) -> (i32, i32) {
    %c0_i32 = arith.constant 0 : i32
    %c0_i32_0 = arith.constant 0 : i32
    return %arg1, %c0_i32 : i32, i32
  }
  func.func @transform_2(%arg0: i32, %arg1: i32) -> (i32, i32) {
    %c0_i32 = arith.constant 0 : i32
    %c0_i32_0 = arith.constant 0 : i32
    return %arg1, %c0_i32 : i32, i32
  }
  func.func @transform_3(%arg0: i32, %arg1: i32) -> (i32, i32, i32) {
    %c0_i32 = arith.constant 0 : i32
    %c0_i32_0 = arith.constant 0 : i32
    return %arg0, %arg1, %c0_i32 : i32, i32, i32
  }
}

</mosaic_0001>

<bundles_post_ra>
// kernel: tpu_custom_call.1
= control target key start
LH: loop header
LB: loop body
LE: loop exit
PB: predicated region body
PF: predicated region fallthrough
CT: control target
= control target key end

     0   :  { %8 = vsyncpa [#allocation3], 0  ;;  %s794_s0 = inlined_call_operand.hbm [shape: f32[2,2,256], index: 0, kind: input, shape index: {}]   ;;  %s795_s1 = inlined_call_operand.vmem [shape: f32[2,1], index: 1, kind: input, shape index: {}]   ;;  %s796_s2 = inlined_call_operand.vmem [shape: f32[2,1], index: 2, kind: input, shape index: {}]   ;;  %s797_s3 = inlined_call_operand.hbm [shape: f32[2,2,256], index: 3, kind: output, shape index: {}]  }
   0x1   :  { %10 = vsyncpa [#allocation3 + $0x1], 0 }
   0x2   :  { %11 = vsyncpa [#allocation4], 0 }
   0x3   :  { %13 = vsyncpa [#allocation4 + $0x1], 0  ;;  %s664_s12 = smov 0   ;;  %s666_s13 = smov 0  }
   0x4   :  { %s668_s14 = smov 0   ;;  %s670_s15 = smov 0  }
   0x5   :  { %s672_s16 = smov 0   ;;  %s674_s17 = smov 0  }
   0x6 LB: > { %s441_s18 = sadd.s32 4294967295, %s640_s17   ;;  %s442_s19 = sadd.s32 4294967294, %s640_s17   ;;  %s640_s17 = sphi %s674_s17, %s19_s17   ;;  %s636_s16 = sphi %s672_s16, %s806_s16   ;;  %s632_s15 = sphi %s670_s15, %s805_s15   ;;  %s628_s14 = sphi %s668_s14, %s804_s14   ;;  %s624_s13 = sphi %s666_s13, %s803_s13   ;;  %s620_s12 = sphi %s664_s12, %s802_s12  }
   0x7   : > { %s31_s20 = sadd.s32 1, %s636_s16  ;;  %s40_s21 = sadd.s32 1, %s628_s14 }
   0x8   : > { %p33_p0 = scmp.ge.s32.totalorder %s31_s20, 2  ;;  %p47_p1 = scmp.ne.s32.totalorder %s628_s14, %s624_s13 }
   0x9   : > { %p48_p2 = scmp.eq.s32.totalorder %s640_s17, 0  ;;  %p53_p3 = scmp.ne.s32.totalorder %s624_s13, %s620_s12 }
   0xa   : > { %s808_s20 = smov (%p33_p0, %s31_s20), 0  ;;  %p54_p5 = scmp.eq.s32.totalorder %s441_s18, 0 }
   0xb   : > { %p705_p4 = por %p48_p2, %p47_p1  ;;  %s35_s23 = ssub.s32 %s636_s16, %s808_s20 }
   0xc   : > { %p131_p6 = scmp.eq.s32.totalorder %s441_s18, 1  ;;  %p38_p7 = scmp.eq.s32.totalorder %s35_s23, 0 }
   0xd   : > { %p711_p8 = por %p54_p5, %p53_p3  ;;  %p137_p10 = scmp.eq.s32.totalorder %s442_s19, 1 }
   0xe   : > { %p715_p9 = por %p131_p6, %p47_p1  ;;  %p446_p12 = scmp.ge.s32.totalorder %s640_s17, 2 }
   0xf   : > { %s720_s26 = scalar_select %p38_p7, %s628_s14, %s40_s21  }
  0x10   : > { %p722_p11 = por %p137_p10, %p53_p3  ;;  %p472_p13 = scmp.lt.s32.totalorder %s640_s17, 2 }
  0x11   : > { %s171_s28 = sand.u32 1, %s628_s14   ;;  %s458_s30 = sshll.u32 %s636_s16, 2 }
  0x12   : > { %s447_s29 = sshll.u32 %s171_s28, 2  ;;  %s182_s6 = scalar_lea.hbm %s794_s0, %s458_s30 }
  0x13   : > { %s175_s7 = scalar_lea.vmem [#allocation2], %s447_s29  ;;  %s184_s9 = sshll.u32 %s182_s6, 4  ;;  %s185_s9 = int_to_ptr.hbm [resolvable:$true] %s184_s9 }
  0x14   : > { %s186_s8 = sshll.u32 %s175_s7, 4  ;;  %p465_p0 = pnand %p472_p13, %p705_p4  ;;  %s187_s8 = int_to_ptr.vmem [resolvable:$true] %s186_s8 }
  0x15   : > { %p450_p1 = scmp.ge.s32.totalorder %s640_s17, 1  ;;  %p191_p2 = scmp.lt.s32.totalorder %s640_s17, 3 }
  0x16   : > { %s172_s10 = scalar_lea.sflag [#allocation3], %s171_s28 }
  0x17   : > { %467 = dma.hbm_to_vmem [thread:$0]  (!%p465_p0), %s185_s9, 64, %s187_s8, %s172_s10  }
  0x18   : > { %p192_p3 = pnand %p450_p1, %p191_p2 }
  0x19   : > { %s738_s11 = sand.u32 (!%p192_p3), 1, %s624_s13  }
  0x1a   : > { %195 = sbr.rel (%p192_p3) target bundleno = 326 (0x146), region = 32  ;;  %s451_s18 = sshll.u32 (!%p192_p3), %s738_s11, 2 }
  0x1b   : > { %s198_s19 = scalar_lea.sflag (!%p192_p3), [#allocation3], %s738_s11  ;;  %s201_s21 = scalar_lea.vmem (!%p192_p3), [#allocation2], %s451_s18 }
  0x1f   : > { %611 = dma.done.wait (%p711_p8), %s198_s19, 64  }
  0x20   : > { %613 = vsyncadd (%p711_p8), %s198_s19, 4294967232  ;;  %v241_v0 = vld [vmem:[%s201_s21] sm:$0xf]  ;;  %vm248_vm0 = vcmask 1041408   ;;  %v642_v12 = vmov 0   ;;  %s459_s29 = sshll.u32 %s632_s15, 2 }
  0x21   : > { %243 = vst [vmem:[#allocation1] ss:$4 sm:$0xff] %v241_v0  ;;  %v254_v1 = vmul.f32 %v241_v0, %v241_v0  ;;  %524 = vset.pattern.permute.xlu1 %v642_v12  ;;  %525 = vset.pattern.permute.xlu0 %v642_v12  ;;  %v271_v26 = vld [vmem:[%s795_s1] sm:$0x3]  ;;  %v643_v33 = vmov 269488144   ;;  %s322_s5 = scalar_lea.hbm %s797_s3, %s459_s29 }
  0x22   : > { %v284_v31 = vld [vmem:[%s796_s2] sm:$0x3]  ;;  %v292_v34 = vunpack.c.l.s4 %v643_v33  ;;  %s232_s6 = scalar_lea.vmem [#allocation5], %s451_s18  ;;  %s326_s8 = sshll.u32 %s322_s5, 4  ;;  %s327_s8 = int_to_ptr.hbm [resolvable:$true] %s326_s8 }
  0x23   : > { %s324_s7 = sshll.u32 %s232_s6, 4  ;;  %s309_s9 = scalar_lea.sflag [#allocation4], %s738_s11  ;;  %s325_s7 = int_to_ptr.vmem [resolvable:$true] %s324_s7 }
  0x24   : > { %v293_v36 = vunpack.c.0.s8 %v292_v34  ;;  %s572_s10 = sshra.s32 %s327_s8, 4  ;;  %s578_s18 = scalar_lea.hbm %s797_s3, 8  ;;  %s573_s10 = int_to_ptr.hbm [resolvable:$true] %s572_s10 }
  0x25   : > { %s574_s15 = scalar_lea.hbm %s573_s10, 4  ;;  %p579_p7 = scmp.lt.s32.totalorder %s573_s10, %s797_s3 }
  0x26   : > { %p575_p4 = scmp.ne.s32.totalorder %s573_s10, %s574_s15  ;;  %p580_p8 = scmp.lt.s32.totalorder %s578_s18, %s574_s15 }
  0x28   : > { %v244_v2 = vld.sshfl [vmem:[#allocation1] sm:$0xff pattern:$0x73625140]  ;;  %v245_v3 = vld.sshfl [vmem:[#allocation1 + $0x8] sm:$0xff pattern:$0x73625140]  ;;  %p576_p5 = pnand %p575_p4, %p715_p9  ;;  %p581_p10 = por %p580_p8, %p579_p7 }
  0x29   : > { %v249_v4 = vsel %vm248_vm0, %v244_v2, 0.0  ;;  %v250_v5 = vsel %vm248_vm0, %v245_v3, 0.0  ;;  %256 = vst [vmem:[#allocation1] ss:$4 sm:$0xff] %v254_v1 }
  0x2a   : > { %v251_v6 = vadd.f32 %v250_v5, %v249_v4  ;;  %p577_p6 = pneg %p576_p5 }
  0x2c   : > { %252 = vadd.xlane.f32.xlu0 %v251_v6  ;;  %p582_p13 = pnand %p581_p10, %p577_p6 }
  0x30   : > { %v257_v7 = vld.sshfl [vmem:[#allocation1] sm:$0xff pattern:$0x73625140]  ;;  %v258_v8 = vld.sshfl [vmem:[#allocation1 + $0x8] sm:$0xff pattern:$0x73625140] }
  0x31   : > { %v261_v9 = vsel %vm248_vm0, %v257_v7, 0.0  ;;  %v262_v10 = vsel %vm248_vm0, %v258_v8, 0.0 }
  0x32   : > { %v263_v11 = vadd.f32 %v262_v10, %v261_v9 }
  0x34   : > { %264 = vadd.xlane.f32.xlu0 %v263_v11 }
  0x9f   : > { %v253_v13 = vpop.xlane.xlu0 %252 }
  0xa0   : > { %v266_v14 = vmul.f32 0.00390625, %v253_v13 }
  0xa2   : > { %v268_v16 = vmul.f32 %v266_v14, %v266_v14 }
  0xa7   : > { %v265_v15 = vpop.xlane.xlu0 %264 }
  0xa8   : > { %v267_v17 = vmul.f32 0.00390625, %v265_v15 }
  0xaa   : > { %v269_v18 = vsub.f32 %v267_v17, %v268_v16 }
  0xac   : > { %v270_v19 = vmax.f32 %v269_v18, 0.0 }
  0xae   : > { %v272_v20 = vadd.f32 1e-05, %v270_v19 }
  0xb0   : > { %526 = vrsqrt.f32 %v272_v20  ;;  %vm279_vm2 = vweird.f32 %v272_v20 }
  0xb6   : > { %v527_v21 = vpop.eup %526 }
  0xb7   : > { %v274_v22 = vmul.f32 %v527_v21, %v272_v20  ;;  %vm280_vm1 = vweird.f32 %v527_v21 }
  0xb8   : > { %vm281_vm3 = vmor %vm279_vm2, %vm280_vm1 }
  0xb9   : > { %v275_v23 = vmul.f32 %v527_v21, %v274_v22 }
  0xbb   : > { %v276_v24 = vmul.f32 0.5, %v275_v23 }
  0xbd   : > { %v277_v25 = vsub.f32 1.5, %v276_v24 }
  0xbf   : > { %v278_v27 = vmul.f32 %v527_v21, %v277_v25 }
  0xc1   : > { %v282_v28 = vsel %vm281_vm3, %v527_v21, %v278_v27 }
  0xc2   : > { %v283_v29 = vmul.f32 %v282_v28, %v271_v26 }
  0xc4   : > { %289 = vperm.xlu1 %524, %v283_v29   ;;  %v285_v30 = vmul.f32 %v283_v29, %v266_v14 }
  0xc6   : > { %v286_v32 = vsub.f32 %v284_v31, %v285_v30 }
  0xcc   : > { %299 = vperm.xlu1 %524, %v286_v32  }
 0x136   : > { %v290_v35 = vpop.permute.xlu1 %289 }
 0x137   : > { %v294_v37 = vperm.slane %v290_v35, %v293_v36 }
 0x139   : > { %v296_v39 = vmul.f32 %v294_v37, %v241_v0 }
 0x13e   : > { %v300_v38 = vpop.permute.xlu1 %299 }
 0x13f   : > { %v304_v40 = vperm.slane %v300_v38, %v293_v36 }
 0x141   : > { %v306_v41 = vadd.f32 %v304_v40, %v296_v39 }
 0x143   : > { %307 = vst [vmem:[%s232_s6] sm:$0xf] %v306_v41 }
 0x144   : > { %585 = shalt.err (!%p582_p13)
}
 0x145   : > { %462 = dma.vmem_to_hbm [thread:$0]  (%p715_p9), %s325_s7, 64, %s327_s8, %s309_s9  }
 0x146 PF: > { %s338_s11 = sand.u32 1, %s620_s12   ;;  %p469_p0 = pnand %p446_p12, %p722_p11 }
 0x147   : > { %s339_s24 = scalar_lea.sflag [#allocation4], %s338_s11 }
 0x148   : > { %p470_p1 = pneg %p469_p0 }
 0x14a   : > { %615 = dma.done.wait (%p470_p1), %s339_s24, 64  }
 0x14b   : > { %617 = vsyncadd (%p470_p1), %s339_s24, 4294967232  ;;  %s19_s17 = sadd.s32 1, %s640_s17   ;;  %s802_s12 = smov %s624_s13 }
 0x14c   : > { %p16_p2 = scmp.ge.s32.totalorder %s19_s17, 4   ;;  %s803_s13 = smov %s628_s14 }
 0x14d   : > { %s804_s14 = smov %s720_s26  ;;  %s805_s15 = smov %s636_s16 }
 0x14e   : > { %s806_s16 = smov %s808_s20  ;;  %18 = sbr.rel (!%p16_p2) target bundleno = 6 (0x6), region = 83 }
 0x153   :  { %345 = vsyncpa [#allocation3], 1 }
 0x154   :  { %347 = vsyncpa [#allocation3 + $0x1], 1 }
 0x155   :  { %348 = vsyncpa [#allocation4], 1 }
 0x156   :  { %350 = vsyncpa [#allocation4 + $0x1], 1 }

</bundles_post_ra>
